<compile_context>
chip_gen: v7x
topology: tpu7x:2x2x1
jax: 0.10.0
libtpu: 0.0.40
codegen_flags: <defaults>
</compile_context>

<pallas_src>
import functools

import jax
import jax.numpy as jnp
from jax.experimental import pallas as pl
from jax.experimental.pallas import tpu as pltpu


HID = 128


def _round_up(x, m):
    return ((x + m - 1) // m) * m


def _critic_kernel(x_ref, wf_ref, b1_ref, w2x_ref, b2_ref, w3_ref, b3_ref,
                   w4row_ref, b4_ref, out_ref):
    """One batch tile of the MLP.  Weights stay VMEM-resident across the grid."""
    f32 = jnp.float32
    bf16 = jnp.bfloat16

    x = x_ref[...].astype(bf16)                                   # (TB, S+A)

    # Fused layer1 + action contraction: one K=(S+A), N=256 MXU pass through
    # blockdiag(W1, W2a).  Cols [0,128) = pre-bias h1, cols [128,256) = a @ W2a.
    y = jnp.dot(x, wf_ref[...], preferred_element_type=f32)       # (TB, 256)
    h1 = jnp.maximum(y[:, :HID] + b1_ref[...], 0.0)               # f32 VPU
    act_pre = y[:, HID:]                                          # (TB, 128)

    # layer2: Linear(128 + action_size, 128) + ReLU == h1 @ W2x + act_pre + b2
    h2 = jnp.dot(h1.astype(bf16), w2x_ref[...], preferred_element_type=f32)
    h2 = jnp.maximum(h2 + act_pre + b2_ref[...], 0.0)

    # layer3: Linear(128, 128) + ReLU
    h3 = jnp.dot(h2.astype(bf16), w3_ref[...], preferred_element_type=f32)
    h3 = jnp.maximum(h3 + b3_ref[...], 0.0)

    # layer4: Linear(128, 1) as VPU multiply + XLU lane reduction (no MXU pass).
    q = jnp.sum(h3 * w4row_ref[...], axis=-1, keepdims=True) + b4_ref[...]
    out_ref[...] = q


def prepare_params(params, state_size, action_size):
    """One-time weight preprocessing (hoisted out of the forward hot path)."""
    w1, b1, w2, b2, w3, b3, w4, b4 = params
    f32, bf16 = jnp.float32, jnp.bfloat16
    assert w1.shape == (state_size, HID), w1.shape
    assert w2.shape == (HID + action_size, HID), w2.shape
    assert w3.shape == (HID, HID), w3.shape
    assert w4.shape == (HID, 1), w4.shape

    # Block-diagonal fused weight for the first MXU pass:
    #   [obs | action] @ [[W1, 0], [0, W2a]]  ->  [pre-h1 | a @ W2a]
    wf = jnp.zeros((state_size + action_size, 2 * HID), f32)
    wf = wf.at[:state_size, :HID].set(w1.astype(f32))
    wf = wf.at[state_size:, HID:].set(w2[HID:HID + action_size, :].astype(f32))

    return (wf.astype(bf16),                            # (S+A, 256)  bf16
            b1.reshape(1, HID).astype(f32),
            w2[:HID, :].astype(bf16),                   # (128, 128)  bf16
            b2.reshape(1, HID).astype(f32),
            w3.astype(bf16),                            # (128, 128)  bf16
            b3.reshape(1, HID).astype(f32),
            jnp.transpose(w4).astype(f32),              # (1, 128)
            b4.reshape(1, 1).astype(f32))


@functools.partial(jax.jit, static_argnames=("state_size", "action_size"))
def vector_obs_critic_forward(obs, action, prepared, *, state_size, action_size):
    """obs: (B, state_size), action: (B, action_size) -> (B, 1) f32."""
    B = obs.shape[0]
    feat = state_size + action_size

    # Batch tile: multiple of 8 (f32 sublane tile), capped at 1024, and sized so
    # the grid has >= 2 steps when possible (v7x: both TensorCores engaged).
    TB = min(1024, _round_up(max(pl.cdiv(B, 2), 1), 8))
    B_pad = _round_up(B, TB)
    grid = (B_pad // TB,)

    # The fused first matmul needs [obs | action]; the batch tail (if any) is
    # folded into this same concat pass instead of a separate full-array pad.
    obs = obs.astype(jnp.float32)
    action = action.astype(jnp.float32)
    if B_pad == B:
        xcat = jnp.concatenate([obs, action], axis=-1)
    else:
        xcat = (jnp.zeros((B_pad, feat), jnp.float32)
                .at[:B, :state_size].set(obs)
                .at[:B, state_size:].set(action))

    wf, b1, w2x, b2, w3, b3, w4row, b4 = prepared

    def tile_spec(f):
        return pl.BlockSpec((TB, f), lambda i: (i, 0))

    def resident(arr):
        return pl.BlockSpec(arr.shape, lambda i: (0, 0))

    out = pl.pallas_call(
        _critic_kernel,
        out_shape=jax.ShapeDtypeStruct((B_pad, 1), jnp.float32),
        grid=grid,
        in_specs=[tile_spec(feat),
                  resident(wf), resident(b1),
                  resident(w2x), resident(b2),
                  resident(w3), resident(b3),
                  resident(w4row), resident(b4)],
        out_specs=pl.BlockSpec((TB, 1), lambda i: (i, 0)),
        compiler_params=pltpu.CompilerParams(
            dimension_semantics=("parallel",)),
    )(xcat, wf, b1, w2x, b2, w3, b3, w4row, b4)

    return out[:B]


def init_params(key, state_size, action_size):
    """Deterministic PyTorch-Linear-style init: U(-1/sqrt(fan_in), 1/sqrt(fan_in))."""
    def linear(key, fan_in, fan_out):
        kw, kb = jax.random.split(key)
        bound = 1.0 / jnp.sqrt(jnp.float32(fan_in))
        w = jax.random.uniform(kw, (fan_in, fan_out), jnp.float32, -bound, bound)
        b = jax.random.uniform(kb, (fan_out,), jnp.float32, -bound, bound)
        return w, b

    k1, k2, k3, k4 = jax.random.split(key, 4)
    w1, b1 = linear(k1, state_size, HID)            # Linear(state_size, 128)
    w2, b2 = linear(k2, HID + action_size, HID)     # Linear(130, 128)
    w3, b3 = linear(k3, HID, HID)                   # Linear(128, 128)
    w4, b4 = linear(k4, HID, 1)                     # Linear(128, 1)
    return (w1, b1, w2, b2, w3, b3, w4, b4)


def reference_forward(obs, action, params):
    """Pure-JAX f32 reference matching the PyTorch forward exactly."""
    w1, b1, w2, b2, w3, b3, w4, b4 = params
    x = jnp.maximum(obs @ w1 + b1, 0.0)
    x = jnp.concatenate([x, action], axis=-1)
    x = jnp.maximum(x @ w2 + b2, 0.0)
    x = jnp.maximum(x @ w3 + b3, 0.0)
    return x @ w4 + b4


if __name__ == "__main__":
    state_size = 16
    action_size = 2
    batch = 6          # non-multiple of 8 to exercise the batch-tail path

    key = jax.random.PRNGKey(0)
    k_params, k_obs, k_act = jax.random.split(key, 3)

    raw_params = init_params(k_params, state_size, action_size)
    prepared = prepare_params(raw_params, state_size, action_size)

    obs = jax.random.normal(k_obs, (batch, state_size), jnp.float32)
    action = jax.random.normal(k_act, (batch, action_size), jnp.float32)

    q_val = vector_obs_critic_forward(obs, action, prepared,
                                      state_size=state_size,
                                      action_size=action_size)
    q_val = jax.block_until_ready(q_val)

    q_ref = reference_forward(obs, action, raw_params)
    assert q_val.shape == (batch, 1), q_val.shape
    max_err = float(jnp.max(jnp.abs(q_val - q_ref)))
    # bf16 MXU operands with f32 accumulation -> tolerance loosened vs pure f32.
    assert jnp.allclose(q_val, q_ref, atol=3e-2, rtol=3e-2), (
        f"mismatch: max abs err {max_err}")

    print("KERNEL_OK")
</pallas_src>

<mosaic_0001>
module attributes {stable_mosaic.version = 11 : i64} {
  func.func @_critic_kernel(%arg0: i32, %arg1: memref<8x18xf32, #tpu.memory_space<vmem>>, %arg2: memref<18x256xbf16, #tpu.memory_space<vmem>>, %arg3: memref<1x128xf32, #tpu.memory_space<vmem>>, %arg4: memref<128x128xbf16, #tpu.memory_space<vmem>>, %arg5: memref<1x128xf32, #tpu.memory_space<vmem>>, %arg6: memref<128x128xbf16, #tpu.memory_space<vmem>>, %arg7: memref<1x128xf32, #tpu.memory_space<vmem>>, %arg8: memref<1x128xf32, #tpu.memory_space<vmem>>, %arg9: memref<1x1xf32, #tpu.memory_space<vmem>>, %arg10: memref<8x1xf32, #tpu.memory_space<vmem>>) attributes {dimension_semantics = [#tpu.dimension_semantics<parallel>], iteration_bounds = array<i64: 1>, scalar_prefetch = 0 : i64, scratch_operands = 0 : i64, tpu.core_type = #tpu.core_type<tc>, window_params = [{transform_indices = @transform_0, window_bounds = array<i64: 8, 18>}, {pipeline_mode = #tpu.pipeline_mode<synchronous>, transform_indices = @transform_1, window_bounds = array<i64: 18, 256>}, {pipeline_mode = #tpu.pipeline_mode<synchronous>, transform_indices = @transform_2, window_bounds = array<i64: 1, 128>}, {pipeline_mode = #tpu.pipeline_mode<synchronous>, transform_indices = @transform_3, window_bounds = array<i64: 128, 128>}, {pipeline_mode = #tpu.pipeline_mode<synchronous>, transform_indices = @transform_4, window_bounds = array<i64: 1, 128>}, {pipeline_mode = #tpu.pipeline_mode<synchronous>, transform_indices = @transform_5, window_bounds = array<i64: 128, 128>}, {pipeline_mode = #tpu.pipeline_mode<synchronous>, transform_indices = @transform_6, window_bounds = array<i64: 1, 128>}, {pipeline_mode = #tpu.pipeline_mode<synchronous>, transform_indices = @transform_7, window_bounds = array<i64: 1, 128>}, {pipeline_mode = #tpu.pipeline_mode<synchronous>, transform_indices = @transform_8, window_bounds = array<i64: 1, 1>}, {transform_indices = @transform_9, window_bounds = array<i64: 8, 1>}]} {
    %c0 = arith.constant 0 : index
    %c0_0 = arith.constant 0 : index
    %0 = vector.load %arg1[%c0, %c0_0] : memref<8x18xf32, #tpu.memory_space<vmem>>, vector<8x18xf32>
    %1 = arith.truncf %0 : vector<8x18xf32> to vector<8x18xbf16>
    %c0_1 = arith.constant 0 : index
    %c0_2 = arith.constant 0 : index
    %2 = vector.load %arg2[%c0_1, %c0_2] : memref<18x256xbf16, #tpu.memory_space<vmem>>, vector<18x256xbf16>
    %cst = arith.constant dense<0.000000e+00> : vector<8x256xf32>
    %3 = tpu.matmul %1, %2, %cst {dimension_numbers = #tpu.dot_dimension_numbers<[1], [0], [0], [1], [0, 0, 1, 1], [], []>} : vector<8x18xbf16>, vector<18x256xbf16>, vector<8x256xf32> -> vector<8x256xf32>
    %4 = vector.extract_strided_slice %3 {offsets = [0, 0], sizes = [8, 128], strides = [1, 1]} : vector<8x256xf32> to vector<8x128xf32>
    %c0_3 = arith.constant 0 : index
    %c0_4 = arith.constant 0 : index
    %5 = vector.load %arg3[%c0_3, %c0_4] : memref<1x128xf32, #tpu.memory_space<vmem>>, vector<1x128xf32>
    %6 = vector.broadcast %5 : vector<1x128xf32> to vector<8x128xf32>
    %7 = arith.addf %4, %6 : vector<8x128xf32>
    %cst_5 = arith.constant 0.000000e+00 : f32
    %8 = vector.broadcast %cst_5 : f32 to vector<8x128xf32>
    %9 = arith.maximumf %7, %8 : vector<8x128xf32>
    %10 = vector.extract_strided_slice %3 {offsets = [0, 128], sizes = [8, 128], strides = [1, 1]} : vector<8x256xf32> to vector<8x128xf32>
    %11 = arith.truncf %9 : vector<8x128xf32> to vector<8x128xbf16>
    %c0_6 = arith.constant 0 : index
    %c0_7 = arith.constant 0 : index
    %12 = vector.load %arg4[%c0_6, %c0_7] : memref<128x128xbf16, #tpu.memory_space<vmem>>, vector<128x128xbf16>
    %cst_8 = arith.constant dense<0.000000e+00> : vector<8x128xf32>
    %13 = tpu.matmul %11, %12, %cst_8 {dimension_numbers = #tpu.dot_dimension_numbers<[1], [0], [0], [1], [0, 0, 1, 1], [], []>} : vector<8x128xbf16>, vector<128x128xbf16>, vector<8x128xf32> -> vector<8x128xf32>
    %14 = arith.addf %13, %10 : vector<8x128xf32>
    %c0_9 = arith.constant 0 : index
    %c0_10 = arith.constant 0 : index
    %15 = vector.load %arg5[%c0_9, %c0_10] : memref<1x128xf32, #tpu.memory_space<vmem>>, vector<1x128xf32>
    %16 = vector.broadcast %15 : vector<1x128xf32> to vector<8x128xf32>
    %17 = arith.addf %14, %16 : vector<8x128xf32>
    %cst_11 = arith.constant 0.000000e+00 : f32
    %18 = vector.broadcast %cst_11 : f32 to vector<8x128xf32>
    %19 = arith.maximumf %17, %18 : vector<8x128xf32>
    %20 = arith.truncf %19 : vector<8x128xf32> to vector<8x128xbf16>
    %c0_12 = arith.constant 0 : index
    %c0_13 = arith.constant 0 : index
    %21 = vector.load %arg6[%c0_12, %c0_13] : memref<128x128xbf16, #tpu.memory_space<vmem>>, vector<128x128xbf16>
    %cst_14 = arith.constant dense<0.000000e+00> : vector<8x128xf32>
    %22 = tpu.matmul %20, %21, %cst_14 {dimension_numbers = #tpu.dot_dimension_numbers<[1], [0], [0], [1], [0, 0, 1, 1], [], []>} : vector<8x128xbf16>, vector<128x128xbf16>, vector<8x128xf32> -> vector<8x128xf32>
    %c0_15 = arith.constant 0 : index
    %c0_16 = arith.constant 0 : index
    %23 = vector.load %arg7[%c0_15, %c0_16] : memref<1x128xf32, #tpu.memory_space<vmem>>, vector<1x128xf32>
    %24 = vector.broadcast %23 : vector<1x128xf32> to vector<8x128xf32>
    %25 = arith.addf %22, %24 : vector<8x128xf32>
    %cst_17 = arith.constant 0.000000e+00 : f32
    %26 = vector.broadcast %cst_17 : f32 to vector<8x128xf32>
    %27 = arith.maximumf %25, %26 : vector<8x128xf32>
    %c0_18 = arith.constant 0 : index
    %c0_19 = arith.constant 0 : index
    %28 = vector.load %arg8[%c0_18, %c0_19] : memref<1x128xf32, #tpu.memory_space<vmem>>, vector<1x128xf32>
    %29 = vector.broadcast %28 : vector<1x128xf32> to vector<8x128xf32>
    %30 = arith.mulf %27, %29 : vector<8x128xf32>
    %cst_20 = arith.constant dense<0.000000e+00> : vector<8xf32>
    %31 = vector.multi_reduction <add>, %30, %cst_20 [1] : vector<8x128xf32> to vector<8xf32>
    %32 = vector.shape_cast %31 : vector<8xf32> to vector<8x1xf32>
    %c0_21 = arith.constant 0 : index
    %c0_22 = arith.constant 0 : index
    %33 = vector.load %arg9[%c0_21, %c0_22] : memref<1x1xf32, #tpu.memory_space<vmem>>, vector<1x1xf32>
    %34 = vector.broadcast %33 : vector<1x1xf32> to vector<8x1xf32>
    %35 = arith.addf %32, %34 : vector<8x1xf32>
    %c0_23 = arith.constant 0 : index
    %c0_24 = arith.constant 0 : index
    %36 = vector.load %arg10[%c0_23, %c0_24] : memref<8x1xf32, #tpu.memory_space<vmem>>, vector<8x1xf32>
    tpu.vector_store %arg10[%c0_23, %c0_24], %35 {strides = array<i32>} : memref<8x1xf32, #tpu.memory_space<vmem>>, vector<8x1xf32>,
    return
  }
  func.func @transform_0(%arg0: i32) -> (i32, i32) {
    %c0_i32 = arith.constant 0 : i32
    %c0_i32_0 = arith.constant 0 : i32
    return %arg0, %c0_i32 : i32, i32
  }
  func.func @transform_1(%arg0: i32) -> (i32, i32) {
    %c0_i32 = arith.constant 0 : i32
    %c0_i32_0 = arith.constant 0 : i32
    %c0_i32_1 = arith.constant 0 : i32
    return %c0_i32, %c0_i32_0 : i32, i32
  }
  func.func @transform_2(%arg0: i32) -> (i32, i32) {
    %c0_i32 = arith.constant 0 : i32
    %c0_i32_0 = arith.constant 0 : i32
    %c0_i32_1 = arith.constant 0 : i32
    return %c0_i32, %c0_i32_0 : i32, i32
  }
  func.func @transform_3(%arg0: i32) -> (i32, i32) {
    %c0_i32 = arith.constant 0 : i32
    %c0_i32_0 = arith.constant 0 : i32
    %c0_i32_1 = arith.constant 0 : i32
    return %c0_i32, %c0_i32_0 : i32, i32
  }
  func.func @transform_4(%arg0: i32) -> (i32, i32) {
    %c0_i32 = arith.constant 0 : i32
    %c0_i32_0 = arith.constant 0 : i32
    %c0_i32_1 = arith.constant 0 : i32
    return %c0_i32, %c0_i32_0 : i32, i32
  }
  func.func @transform_5(%arg0: i32) -> (i32, i32) {
    %c0_i32 = arith.constant 0 : i32
    %c0_i32_0 = arith.constant 0 : i32
    %c0_i32_1 = arith.constant 0 : i32
    return %c0_i32, %c0_i32_0 : i32, i32
  }
  func.func @transform_6(%arg0: i32) -> (i32, i32) {
    %c0_i32 = arith.constant 0 : i32
    %c0_i32_0 = arith.constant 0 : i32
    %c0_i32_1 = arith.constant 0 : i32
    return %c0_i32, %c0_i32_0 : i32, i32
  }
  func.func @transform_7(%arg0: i32) -> (i32, i32) {
    %c0_i32 = arith.constant 0 : i32
    %c0_i32_0 = arith.constant 0 : i32
    %c0_i32_1 = arith.constant 0 : i32
    return %c0_i32, %c0_i32_0 : i32, i32
  }
  func.func @transform_8(%arg0: i32) -> (i32, i32) {
    %c0_i32 = arith.constant 0 : i32
    %c0_i32_0 = arith.constant 0 : i32
    %c0_i32_1 = arith.constant 0 : i32
    return %c0_i32, %c0_i32_0 : i32, i32
  }
  func.func @transform_9(%arg0: i32) -> (i32, i32) {
    %c0_i32 = arith.constant 0 : i32
    %c0_i32_0 = arith.constant 0 : i32
    return %arg0, %c0_i32 : i32, i32
  }
}

</mosaic_0001>

<bundles_post_ra>
// kernel: vector_obs_critic_forward.1
= control target key start
LH: loop header
LB: loop body
LE: loop exit
PB: predicated region body
PF: predicated region fallthrough
CT: control target
= control target key end

     0   :  { %s658_s0 = inlined_call_operand.vmem [shape: f32[8,18], index: 0, kind: input, shape index: {}]   ;;  %s659_s1 = inlined_call_operand.vmem [shape: bf16[18,256], index: 1, kind: input, shape index: {}]   ;;  %s660_s2 = inlined_call_operand.vmem [shape: f32[1,128], index: 2, kind: input, shape index: {}]   ;;  %s661_s3 = inlined_call_operand.vmem [shape: bf16[128,128], index: 3, kind: input, shape index: {}]   ;;  %s662_s4 = inlined_call_operand.vmem [shape: f32[1,128], index: 4, kind: input, shape index: {}]   ;;  %s663_s5 = inlined_call_operand.hbm [shape: bf16[128,128], index: 5, kind: input, shape index: {}]   ;;  %s664_s6 = inlined_call_operand.vmem [shape: f32[1,128], index: 6, kind: input, shape index: {}]   ;;  %s665_s7 = inlined_call_operand.vmem [shape: f32[1,128], index: 7, kind: input, shape index: {}]   ;;  %s666_s8 = inlined_call_operand.<no memory space> [shape: f32[1,1], index: 8, kind: input, shape index: {}]   ;;  %s667_s9 = inlined_call_operand.vmem [shape: f32[8,1], index: 9, kind: output, shape index: {}]  }
   0x1   :  { %v14_v0 = vstv %s666_s8 }
   0x2   :  { %15 = vst [vmem:[#allocation2] sm:$0x1] %v14_v0 }
   0x3   :  { %16 = vsyncpa [#allocation4], 0  ;;  %s518_s11 = smov [#allocation3]   ;;  %s494_s15 = scalar_lea.hbm %s663_s5, 1024 }
   0x4   :  { %s32_s12 = sshll.u32 %s518_s11, 4  ;;  %p495_p0 = scmp.ne.s32.totalorder %s663_s5, %s494_s15  ;;  %s33_s12 = int_to_ptr.vmem [resolvable:$true] %s32_s12 }
   0x5   :  { %p498_p1 = scmp.lt.u32.totalorder %s494_s15, %s663_s5 }
   0x7   :  { %p500_p2 = pnand %p498_p1, %p495_p0 }
   0x9   :  { %503 = shalt.err (!%p500_p2)
}
   0xa   :  { %s504_s8 = scalar_lea.vmem %s33_s12, 1024  ;;  %p509_p4 = scmp.lt.s32.totalorder %s33_s12, %s33_s12 }
   0xb   :  { %p505_p3 = scmp.ne.s32.totalorder %s33_s12, %s504_s8  ;;  %p510_p5 = scmp.lt.s32.totalorder %s504_s8, %s504_s8 }
   0xd   :  { %p511_p6 = por %p510_p5, %p509_p4 }
   0xf   :  { %p512_p7 = pnand %p511_p6, %p505_p3 }
  0x11   :  { %515 = shalt.err (!%p512_p7)
}
  0x12   :  { %s519_s20 = smov 64   ;;  %s520_s21 = smov 4  }
  0x13   :  { %38 = dma.hbm_to_vmem [thread:$0]  %s663_s5, 1024, %s33_s12, [#allocation4], %s519_s20, %s519_s20, %s520_s21  }
  0x14   :  { %516 = dma.done.wait [#allocation4], 1024  }
  0x15   :  { %517 = vsyncadd [#allocation4], 4294966272  ;;  %v521_v1 = vmov 0   ;;  %v522_v2 = vmov 0.0   ;;  %v473_v3 = vld [vmem:[%s659_s1 + $0x4] ss:$8 sps:$4 sm:$0xff]  }
  0x16   :  { %112 = vmatprep.mubr.bf16.mxu0 %v521_v1  ;;  %427 = vmatprep.subr.bf16.mxu1 %v522_v2  ;;  %v475_v4 = vld [vmem:[%s659_s1] ss:$8 sps:$4 sm:$0xff]   ;;  %v53_v5 = vld [vmem:[%s659_s1 + $0x10] sm:$0x11]  ;;  %vm73_vm0 = vcmask 1040384   ;;  %vm69_vm1 = vcmask 146432  }
  0x17   :  { %80 = vmatprep.subr.bf16.mxu0 %v473_v3  ;;  %v385_v6 = vcombine.high %v53_v5, %v53_v5  ;;  %v384_v7 = vcombine.low %v53_v5, %v53_v5  ;;  %v478_v8 = vld [vmem:[%s661_s3] sm:$0xff]   ;;  %v479_v11 = vld [vmem:[%s661_s3 + $0x8] sm:$0xff]   ;;  %v480_v13 = vld [vmem:[%s661_s3 + $0x10] sm:$0xff]   ;;  %vm523_vm2 = vmmov 0   ;;  %vm375_vm3 = vcmask 7168  }
  0x18   :  { %81 = vmatpush1.bf16.msra.mxu0 %v475_v4  ;;  %v49_v9 = vld [vmem:[%s658_s0] sm:$0xff]  ;;  %428 = vmatpush3.bf16.msra.mxu1 %v478_v8  ;;  %v481_v14 = vld [vmem:[%s661_s3 + $0x18] sm:$0xff]   ;;  %v483_v16 = vld [vmem:[%s661_s3 + $0x28] sm:$0xff]  }
  0x19   :  { %386 = vmatprep.subr.msk.bf16.mxu0 %vm73_vm0, %v385_v6  ;;  %v75_v10 = vsel %vm73_vm0, %v384_v7, 0  ;;  %429 = vmatprep.subr.bf16.mxu1 %v522_v2  ;;  %v50_v12 = vpack.c.bf16 %v49_v9, %v49_v9  ;;  %v482_v15 = vld [vmem:[%s661_s3 + $0x20] sm:$0xff]   ;;  %v484_v17 = vld [vmem:[%s661_s3 + $0x30] sm:$0xff]   ;;  %v485_v18 = vld [vmem:[%s661_s3 + $0x38] sm:$0xff]  }
  0x1a   :  { %443 = vmatprep.mubr.msk.bf16.mxu1 %vm523_vm2, %v522_v2  ;;  %v486_v19 = vld [vmem:[#allocation3] sm:$0xff]   ;;  %v487_v20 = vld [vmem:[#allocation3 + $0x8] sm:$0xff]   ;;  %v488_v21 = vld [vmem:[#allocation3 + $0x10] sm:$0xff]  }
  0x1b   :  { %v489_v22 = vld [vmem:[#allocation3 + $0x18] sm:$0xff]   ;;  %v490_v23 = vld [vmem:[#allocation3 + $0x20] sm:$0xff]   ;;  %v491_v24 = vld [vmem:[#allocation3 + $0x28] sm:$0xff]  }
  0x1c   :  { %83 = vmatpush1.bf16.msra.mxu0 %v75_v10  ;;  %430 = vmatpush3.bf16.msra.mxu1 %v479_v11  ;;  %v388_v25 = vld [vmem:[%s660_s2] ss:$0 sm:$0xff]  ;;  %v492_v33 = vld [vmem:[#allocation3 + $0x30] sm:$0xff]  }
  0x1d   :  { %447 = vmatprep.subr.bf16.mxu0 %v522_v2  ;;  %431 = vmatprep.subr.bf16.mxu1 %v522_v2  ;;  %v493_v34 = vld [vmem:[#allocation3 + $0x38] sm:$0xff]  }
  0x1e   :  { %v397_v36 = vld [vmem:[%s662_s4] ss:$0 sm:$0xff] }
  0x1f   :  { %387 = vmatmul.mubr.msk.bf16.vlgmr.msra.gmra.mrb[0].mxu0 %vm69_vm1, %v50_v12  ;;  %v398_v44 = vld [vmem:[%s664_s6] ss:$0 sm:$0xff] }
  0x20   :  { %432 = vmatpush3.bf16.msra.mxu1 %v480_v13  ;;  %463 = vmatprep.mubr.msk.bf16.mxu0 %vm523_vm2, %v522_v2  ;;  %v407_v49 = vld [vmem:[%s665_s7] ss:$0 sm:$0xff] }
  0x21   :  { %433 = vmatprep.subr.bf16.mxu1 %v522_v2  ;;  %448 = vmatpush3.bf16.msra.mxu0 %v486_v19  ;;  %v408_v53 = vld [vmem:[#allocation2] ss:$0 sm:$0xff] }
  0x22   :  { %449 = vmatprep.subr.bf16.mxu0 %v522_v2 }
  0x24   :  { %434 = vmatpush3.bf16.msra.mxu1 %v481_v14 }
  0x25   :  { %435 = vmatprep.subr.bf16.mxu1 %v522_v2  ;;  %450 = vmatpush3.bf16.msra.mxu0 %v487_v20 }
  0x26   :  { %451 = vmatprep.subr.bf16.mxu0 %v522_v2 }
  0x28   :  { %436 = vmatpush3.bf16.msra.mxu1 %v482_v15 }
  0x29   :  { %437 = vmatprep.subr.bf16.mxu1 %v522_v2  ;;  %452 = vmatpush3.bf16.msra.mxu0 %v488_v21 }
  0x2a   :  { %453 = vmatprep.subr.bf16.mxu0 %v522_v2 }
  0x2c   :  { %438 = vmatpush3.bf16.msra.mxu1 %v483_v16 }
  0x2d   :  { %439 = vmatprep.subr.bf16.mxu1 %v522_v2  ;;  %454 = vmatpush3.bf16.msra.mxu0 %v489_v22 }
  0x2e   :  { %455 = vmatprep.subr.bf16.mxu0 %v522_v2 }
  0x30   :  { %440 = vmatpush3.bf16.msra.mxu1 %v484_v17 }
  0x31   :  { %441 = vmatprep.subr.bf16.mxu1 %v522_v2  ;;  %456 = vmatpush3.bf16.msra.mxu0 %v490_v23 }
  0x32   :  { %457 = vmatprep.subr.bf16.mxu0 %v522_v2 }
  0x34   :  { %442 = vmatpush3.bf16.msra.mxu1 %v485_v18 }
  0x35   :  { %458 = vmatpush3.bf16.msra.mxu0 %v491_v24 }
  0x36   :  { %459 = vmatprep.subr.bf16.mxu0 %v522_v2 }
  0x39   :  { %460 = vmatpush3.bf16.msra.mxu0 %v492_v33 }
  0x3a   :  { %461 = vmatprep.subr.bf16.mxu0 %v522_v2 }
  0x3d   :  { %462 = vmatpush3.bf16.msra.mxu0 %v493_v34 }
  0xf2   :  { %v114_v26 = vpop.f32.mrb[0].mxu0 }
  0xf3   :  { %v128_v27 = vadd.f32 %v388_v25, %v114_v26  ;;  %v116_v28 = vpop.f32.mrb[1].mxu0 }
  0xf4   :  { %v118_v29 = vpop.f32.mrb[2].mxu0 }
  0xf5   :  { %v129_v30 = vmax.f32 %v128_v27, 0.0  ;;  %v119_v31 = vpop.f32.mrb[3].mxu0 }
  0xf7   :  { %v130_v32 = vpack.c.bf16 %v129_v30, %v129_v30 }
  0xf9   :  { %444 = vmatmul.mubr.bf16.vlgmr.msra.gmra.mrb[0].mxu1 %v130_v32 }
 0x1cc   :  { %v229_v35 = vpop.f32.mrb[0].mxu1 }
 0x1cd   :  { %v230_v37 = vadd.f32 %v229_v35, %v116_v28  ;;  %v445_v38 = vpop.f32.mrb[1].mxu1 }
 0x1ce   :  { %v232_v39 = vpop.f32.mrb[2].mxu1 }
 0x1cf   :  { %v242_v40 = vadd.f32 %v397_v36, %v230_v37  ;;  %v446_v41 = vpop.f32.mrb[3].mxu1 }
 0x1d1   :  { %v243_v42 = vmax.f32 %v242_v40, 0.0 }
 0x1d3   :  { %v244_v43 = vpack.c.bf16 %v243_v42, %v243_v42 }
 0x1d5   :  { %464 = vmatmul.mubr.bf16.vlgmr.msra.gmra.mrb[4].mxu0 %v244_v43 }
 0x2a8   :  { %v350_v45 = vpop.f32.mrb[4].mxu0 }
 0x2a9   :  { %v351_v46 = vadd.f32 %v398_v44, %v350_v45  ;;  %v465_v47 = vpop.f32.mrb[5].mxu0 }
 0x2aa   :  { %v353_v48 = vpop.f32.mrb[6].mxu0 }
 0x2ab   :  { %v356_v50 = vmax.f32 %v351_v46, 0.0  ;;  %v466_v51 = vpop.f32.mrb[7].mxu0 }
 0x2ad   :  { %v364_v52 = vmul.f32 %v407_v49, %v356_v50 }
 0x2af   :  { %365 = vadd.xlane.f32.xlu0 %v364_v52 }
 0x33c   :  { %v366_v54 = vpop.xlane.xlu0 %365 }
 0x33d   :  { %v374_v55 = vadd.f32 %v408_v53, %v366_v54 }
 0x33f   :  { %376 = vst.msk [vmem:[%s667_s9] sm:$0xff] %vm375_vm3, %v374_v55 }
 0x340   :  { %381 = vsyncpa [#allocation4], 1 }

</bundles_post_ra>
